<compile_context>
chip_gen: v6e
topology: v6e:2x2x1
jax: 0.10.0
libtpu: 0.0.40
codegen_flags: <defaults>
</compile_context>

<pallas_src>
import math

import jax
import jax.numpy as jnp
from jax.experimental import pallas as pl
from jax.experimental.pallas import tpu as pltpu


# ----------------------------------------------------------------------------
# Generation-aware VMEM budget (v5e/v6e: 128 MiB physical, v7x: 64 MiB).
# ----------------------------------------------------------------------------
def _vmem_limit_bytes():
    cap = 64 * 1024 * 1024                     # conservative fallback (v7x-sized)
    try:
        cap = int(pltpu.get_tpu_info().vmem_capacity_bytes)
    except Exception:
        pass
    # ~75% of physical, always leaving >=16 MiB of headroom for Mosaic scratch.
    return max(32 * 1024 * 1024, min((cap * 3) // 4, cap - 16 * 1024 * 1024))


_VMEM_LIMIT = _vmem_limit_bytes()


def _row_tile(n, target):
    """Row-tile size: whole axis if small, else a multiple-of-8 tile (ragged tail OK)."""
    return n if n <= target else target


def _proj_row_target():
    # Bigger row tiles on 128 MiB parts (v5e/v6e), smaller on v7x (64 MiB).
    return 1024 if _VMEM_LIMIT >= 80 * 1024 * 1024 else 512


# ----------------------------------------------------------------------------
# Pallas kernels
# ----------------------------------------------------------------------------
def _freq_proj_kernel(x_ref, fr_ref, w_ref, wf_ref, b_ref, o_ref):
    # x: (tm, 2D) bf16   fr: (tm, 1) f32   w: (2D, O) bf16   wf/b: (1, O) f32
    acc = jnp.dot(x_ref[...], w_ref[...], preferred_element_type=jnp.float32)
    acc = acc + fr_ref[...] * wf_ref[...] + b_ref[...]   # rank-1 freq term + bias
    o_ref[...] = acc.astype(o_ref.dtype)


def freq_proj_pallas(x, fr, w, wf, brow, out_dtype=jnp.bfloat16):
    """y = [re|im] @ [wre;wim] + fr * wf + brow; rows tiled, weights resident, bf16 out."""
    M, K = x.shape
    O = w.shape[1]
    tm = _row_tile(M, _proj_row_target())
    return pl.pallas_call(
        _freq_proj_kernel,
        out_shape=jax.ShapeDtypeStruct((M, O), out_dtype),
        grid=(pl.cdiv(M, tm),),
        in_specs=[
            pl.BlockSpec((tm, K), lambda i: (i, 0)),
            pl.BlockSpec((tm, 1), lambda i: (i, 0)),
            pl.BlockSpec((K, O), lambda i: (0, 0)),
            pl.BlockSpec((1, O), lambda i: (0, 0)),
            pl.BlockSpec((1, O), lambda i: (0, 0)),
        ],
        out_specs=pl.BlockSpec((tm, O), lambda i: (i, 0)),
        compiler_params=pltpu.CompilerParams(
            dimension_semantics=("parallel",),
            vmem_limit_bytes=_VMEM_LIMIT,
        ),
    )(x, fr, w, wf, brow)


def _linear_kernel(x_ref, w_ref, b_ref, o_ref):
    o_ref[...] = (
        jnp.dot(x_ref[...], w_ref[...], preferred_element_type=jnp.float32)
        + b_ref[...]
    ).astype(o_ref.dtype)


def linear_pallas(x, w, brow):
    """Row-tiled Linear: bf16 x/w, f32 accumulate, f32 output (feeds the irfft)."""
    M, Cin = x.shape
    Cout = w.shape[1]
    tm = _row_tile(M, _proj_row_target())
    return pl.pallas_call(
        _linear_kernel,
        out_shape=jax.ShapeDtypeStruct((M, Cout), jnp.float32),
        grid=(pl.cdiv(M, tm),),
        in_specs=[
            pl.BlockSpec((tm, Cin), lambda i: (i, 0)),
            pl.BlockSpec((Cin, Cout), lambda i: (0, 0)),
            pl.BlockSpec((1, Cout), lambda i: (0, 0)),
        ],
        out_specs=pl.BlockSpec((tm, Cout), lambda i: (i, 0)),
        compiler_params=pltpu.CompilerParams(
            dimension_semantics=("parallel",),
            vmem_limit_bytes=_VMEM_LIMIT,
        ),
    )(x, w, brow)


def _attn_kernel(q_ref, k_ref, v_ref, o_ref, a_ref):
    # One batch element, one query tile, ALL heads per grid step.
    q = q_ref[0]            # (H, tq, E)  bf16; 1/sqrt(E) already folded into Q proj
    k = k_ref[0]            # (H, Sf, E)  bf16
    v = v_ref[0]            # (H, Sf, Dv) bf16
    s = jnp.einsum("hle,hse->hls", q, k, preferred_element_type=jnp.float32)
    m = jnp.max(s, axis=-1, keepdims=True)
    e = jnp.exp(s - m)                                       # f32 softmax (v5e-safe)
    a = e * pl.reciprocal(jnp.sum(e, axis=-1, keepdims=True), approx=True)
    a_ref[0] = a.astype(a_ref.dtype)                         # bf16 writeback (halved HBM)
    ctx = jnp.einsum("hls,hsd->hld", a.astype(v.dtype), v,
                     preferred_element_type=jnp.float32)
    o_ref[0] = ctx.astype(o_ref.dtype)


def _pick_tq(B, H, Lf, Sf, E, Dv, attn_itemsize):
    """Largest query tile that fits ~70% of the scoped VMEM budget (per grid step)."""
    budget = int(_VMEM_LIMIT * 0.7)
    fixed = 2 * H * Sf * (E + Dv) * 2                 # K,V blocks (bf16, double-buffered)
    per_row = (2 * H * E * 2                          # q block   (bf16, double-buffered)
               + 2 * H * Dv * 2                       # ctx out   (bf16, double-buffered)
               + 2 * H * Sf * attn_itemsize           # attn out  (double-buffered)
               + 3 * H * Sf * 4)                      # f32 score/exp intermediates
    avail = budget - fixed
    tq = max(8, avail // per_row) if avail > 0 else 8
    tq = min(Lf, 512, int(tq))
    if B == 1 and Lf > 8:
        # Keep >=2 query tiles so both v7x TensorCores get work via the parallel axis.
        half = -(-Lf // 2)
        tq = min(tq, -(-half // 8) * 8)
    if tq < Lf:
        tq = max(8, (tq // 8) * 8)                    # multiple-of-8 second-minor block dim
    return tq


def full_attention_pallas(q, k, v, attn_dtype=jnp.bfloat16):
    """q,k,v: (B,H,*,E|Dv) bf16 -> (ctx (B,H,Lf,Dv) bf16, attn (B,H,Lf,Sf) attn_dtype)."""
    B, H, Lf, E = q.shape
    Sf = k.shape[2]
    Dv = v.shape[3]
    attn_itemsize = jnp.dtype(attn_dtype).itemsize
    tq = _pick_tq(B, H, Lf, Sf, E, Dv, attn_itemsize)
    cost = pl.CostEstimate(
        flops=2 * B * H * Lf * Sf * (E + Dv),
        transcendentals=B * H * Lf * Sf,
        bytes_accessed=((q.size + k.size + v.size) * q.dtype.itemsize
                        + B * H * Lf * Dv * 2
                        + B * H * Lf * Sf * attn_itemsize),
    )
    return pl.pallas_call(
        _attn_kernel,
        out_shape=(
            jax.ShapeDtypeStruct((B, H, Lf, Dv), jnp.bfloat16),
            jax.ShapeDtypeStruct((B, H, Lf, Sf), attn_dtype),
        ),
        grid=(B, pl.cdiv(Lf, tq)),
        in_specs=[
            pl.BlockSpec((1, H, tq, E), lambda b, i: (b, 0, i, 0)),
            # TODO(synk): K/V are only revisited when b changes; single-buffering them
            # (pipeline_mode=pl.Buffered(1)) would halve their VMEM once that kwarg is
            # confirmed stable on the deployed jax version.
            pl.BlockSpec((1, H, Sf, E), lambda b, i: (b, 0, 0, 0)),
            pl.BlockSpec((1, H, Sf, Dv), lambda b, i: (b, 0, 0, 0)),
        ],
        out_specs=(
            pl.BlockSpec((1, H, tq, Dv), lambda b, i: (b, 0, i, 0)),
            pl.BlockSpec((1, H, tq, Sf), lambda b, i: (b, 0, i, 0)),
        ),
        compiler_params=pltpu.CompilerParams(
            dimension_semantics=("parallel", "parallel"),
            vmem_limit_bytes=_VMEM_LIMIT,
        ),
        cost_estimate=cost,
    )(q, k, v)


# ----------------------------------------------------------------------------
# Pure-JAX references (mirror the kernel numerics/dtype policy; used for self-check)
# ----------------------------------------------------------------------------
def _freq_proj_dense(x, fr, w, wf, brow, out_dtype=jnp.bfloat16):
    acc = jnp.dot(x, w, preferred_element_type=jnp.float32) + fr * wf + brow
    return acc.astype(out_dtype)


def _linear_dense(x, w, brow):
    return jnp.dot(x, w, preferred_element_type=jnp.float32) + brow


def _attn_dense(q, k, v, attn_dtype=jnp.bfloat16):
    s = jnp.einsum("bhle,bhse->bhls", q, k, preferred_element_type=jnp.float32)
    m = jnp.max(s, axis=-1, keepdims=True)
    e = jnp.exp(s - m)
    a = e / jnp.sum(e, axis=-1, keepdims=True)
    ctx = jnp.einsum("bhls,bhsd->bhld", a.astype(v.dtype), v,
                     preferred_element_type=jnp.float32)
    return ctx.astype(jnp.bfloat16), a.astype(attn_dtype)


# ----------------------------------------------------------------------------
# Parameters (deterministic init; shapes follow the PyTorch module __init__)
# ----------------------------------------------------------------------------
def init_params(key, d_model, n_heads, d_keys=None, d_values=None):
    d_keys = d_keys or d_model // n_heads
    d_values = d_values or d_model // n_heads
    kq, kk, kv, ko = jax.random.split(key, 4)

    def conv_init(k, cout, cin):
        k1, k2 = jax.random.split(k)
        w = jax.random.normal(k1, (cout, cin, 3), jnp.float32) / math.sqrt(cin * 3)
        b = jax.random.normal(k2, (cout,), jnp.float32) * 0.01
        return w, b

    Wq, bq = conv_init(kq, d_keys * n_heads, d_model)
    Wk, bk = conv_init(kk, d_keys * n_heads, d_model)
    Wv, bv = conv_init(kv, d_values * n_heads, d_model)
    ko1, ko2 = jax.random.split(ko)
    Wo = jax.random.normal(
        ko1, (2 * d_model, d_values * n_heads), jnp.float32
    ) / math.sqrt(d_values * n_heads)
    bo = jax.random.normal(ko2, (2 * d_model,), jnp.float32) * 0.01
    return dict(
        Wq=Wq, bq=bq, Wk=Wk, bk=bk, Wv=Wv, bv=bv, Wo=Wo, bo=bo,
        n_heads=n_heads, d_keys=d_keys, d_values=d_values,
    )


# ----------------------------------------------------------------------------
# FFTAttention forward
# ----------------------------------------------------------------------------
def fft_attention_forward(params, queries, keys, values, use_pallas=True,
                          attn_dtype=jnp.bfloat16):
    B, L, d_model = queries.shape
    _, S, _ = keys.shape
    H = params["n_heads"]
    d_k = params["d_keys"]
    d_v = params["d_values"]

    freq_proj = freq_proj_pallas if use_pallas else _freq_proj_dense
    linear = linear_pallas if use_pallas else _linear_dense
    attn_fn = full_attention_pallas if use_pallas else _attn_dense

    # rfft along time of (B, d_model, T) — same permute as PyTorch.       (JAX glue)
    qf = jnp.fft.rfft(jnp.transpose(queries, (0, 2, 1)))    # (B, D, Lf) complex64
    kf = jnp.fft.rfft(jnp.transpose(keys, (0, 2, 1)))       # (B, D, Sf)
    vf = jnp.fft.rfft(jnp.transpose(values, (0, 2, 1)))     # (B, D, Sf)
    Lf, Sf = qf.shape[-1], kf.shape[-1]
    freqs_L = jnp.fft.rfftfreq(L).astype(jnp.float32)       # (Lf,)
    freqs_S = jnp.fft.rfftfreq(S).astype(jnp.float32)       # (Sf,)

    def conv_proj(fx, freqs, W, b, scale=1.0):
        # Conv1d(k=3, s=3) over interleaved [re, im, freq] == per-frequency linear.
        # Fused into a single matmul over the concatenated [re | im] features; the
        # frequency channel is a rank-1 term added inside the kernel.
        F = fx.shape[-1]
        re = jnp.transpose(jnp.real(fx), (0, 2, 1))               # (B, F, D) f32
        im = jnp.transpose(jnp.imag(fx), (0, 2, 1))
        x = jnp.concatenate([re, im], axis=-1).reshape(B * F, 2 * d_model)
        x = x.astype(jnp.bfloat16)                                # bf16 operand (HBM/2)
        fr = jnp.tile(freqs, (B,)).reshape(B * F, 1)
        w = (jnp.concatenate([W[:, :, 0], W[:, :, 1]], axis=1).T * scale)  # (2D, O)
        w = w.astype(jnp.bfloat16)
        wf = (jnp.sum(W[:, :, 2], axis=1) * scale)[None, :].astype(jnp.float32)  # (1, O)
        brow = (b * scale)[None, :].astype(jnp.float32)                          # (1, O)
        return freq_proj(x, fr, w, wf, brow).reshape(B, F, -1)    # (B, F, O) bf16

    # FullAttention(scale=None -> 1/sqrt(E)); fold the scale into the Q projection
    # so no (Lf,Sf)-wide VALU multiply is needed inside the attention kernel.
    scale = 1.0 / math.sqrt(d_k)
    Q = conv_proj(qf, freqs_L, params["Wq"], params["bq"], scale).reshape(B, Lf, H, d_k)
    K = conv_proj(kf, freqs_S, params["Wk"], params["bk"]).reshape(B, Sf, H, d_k)
    V = conv_proj(vf, freqs_S, params["Wv"], params["bv"]).reshape(B, Sf, H, d_v)

    # Head-major layout for the attention kernel (bf16 already, so half the transpose
    # traffic of the previous f32->bf16 pass).
    q_bhle = jnp.transpose(Q, (0, 2, 1, 3))
    k_bhse = jnp.transpose(K, (0, 2, 1, 3))
    v_bhsd = jnp.transpose(V, (0, 2, 1, 3))

    out_bhld, attn = attn_fn(q_bhle, k_bhse, v_bhsd, attn_dtype=attn_dtype)

    # Faithful to PyTorch: the Informer FullAttention returns V as (B, Lf, H, Dv);
    # FFTAttention then does V.transpose(2,1).contiguous().view(B, Lf, -1), i.e. the
    # plain row-major reinterpretation of the contiguous (B, H, Lf, Dv) buffer where
    # row (b, i) holds flat elements [i*H*Dv, (i+1)*H*Dv) of that buffer — exactly what
    # the reshape below produces (index algebra: (b*Lf+i)*H*Dv + j == b*H*Lf*Dv + i*H*Dv + j).
    V_flat = out_bhld.reshape(B * Lf, H * d_v)                    # bf16, no data movement

    # out_projection: Linear(H*d_v -> 2*d_model), f32 output feeding the irfft.
    Vp = linear(V_flat, params["Wo"].T.astype(jnp.bfloat16), params["bo"][None, :])
    Vp = Vp.reshape(B, Lf, 2 * d_model)

    Vc = Vp.reshape(B, Lf, d_model, 2)
    Vc = jax.lax.complex(Vc[..., 0], Vc[..., 1])                  # (B, Lf, d_model)
    Vc = jnp.transpose(Vc, (0, 2, 1))                             # (B, d_model, Lf)
    out = jnp.fft.irfft(Vc, n=L)                                  # (B, d_model, L)
    out = jnp.transpose(out, (0, 2, 1)).astype(jnp.float32)       # (B, L, d_model)
    return out, attn


# ----------------------------------------------------------------------------
if __name__ == "__main__":
    key = jax.random.PRNGKey(0)
    B, L, S, d_model, H = 2, 16, 16, 32, 4
    kq, kk, kv, kp = jax.random.split(key, 4)
    queries = jax.random.normal(kq, (B, L, d_model), jnp.float32)
    keys_in = jax.random.normal(kk, (B, S, d_model), jnp.float32)
    values_in = jax.random.normal(kv, (B, S, d_model), jnp.float32)
    params = init_params(kp, d_model, H)

    out, attn = fft_attention_forward(params, queries, keys_in, values_in,
                                      use_pallas=True)
    out, attn = jax.block_until_ready((out, attn))

    # Pure-JAX reference with identical dtype policy (verifies the kernel math).
    ref_out, ref_attn = fft_attention_forward(params, queries, keys_in, values_in,
                                              use_pallas=False)

    assert out.shape == (B, L, d_model)
    assert attn.shape == (B, H, L // 2 + 1, S // 2 + 1)
    assert bool(jnp.all(jnp.isfinite(out)))
    assert bool(jnp.allclose(out, ref_out, atol=3e-2, rtol=3e-2))
    assert bool(jnp.allclose(attn.astype(jnp.float32), ref_attn.astype(jnp.float32),
                             atol=2e-2, rtol=2e-2))

    print("KERNEL_OK")
</pallas_src>

<mosaic_0001>
module attributes {stable_mosaic.version = 11 : i64} {
  func.func @_freq_proj_kernel(%arg0: i32, %arg1: memref<18x64xbf16, #tpu.memory_space<vmem>>, %arg2: memref<18x1xf32, #tpu.memory_space<vmem>>, %arg3: memref<64x32xbf16, #tpu.memory_space<vmem>>, %arg4: memref<1x32xf32, #tpu.memory_space<vmem>>, %arg5: memref<1x32xf32, #tpu.memory_space<vmem>>, %arg6: memref<18x32xbf16, #tpu.memory_space<vmem>>) attributes {dimension_semantics = [#tpu.dimension_semantics<parallel>], iteration_bounds = array<i64: 1>, scalar_prefetch = 0 : i64, scratch_operands = 0 : i64, tpu.core_type = #tpu.core_type<tc>, window_params = [{transform_indices = @transform_0, window_bounds = array<i64: 18, 64>}, {transform_indices = @transform_1, window_bounds = array<i64: 18, 1>}, {pipeline_mode = #tpu.pipeline_mode<synchronous>, transform_indices = @transform_2, window_bounds = array<i64: 64, 32>}, {pipeline_mode = #tpu.pipeline_mode<synchronous>, transform_indices = @transform_3, window_bounds = array<i64: 1, 32>}, {pipeline_mode = #tpu.pipeline_mode<synchronous>, transform_indices = @transform_4, window_bounds = array<i64: 1, 32>}, {transform_indices = @transform_5, window_bounds = array<i64: 18, 32>}]} {
    %c0 = arith.constant 0 : index
    %c0_0 = arith.constant 0 : index
    %0 = vector.load %arg1[%c0, %c0_0] : memref<18x64xbf16, #tpu.memory_space<vmem>>, vector<18x64xbf16>
    %c0_1 = arith.constant 0 : index
    %c0_2 = arith.constant 0 : index
    %1 = vector.load %arg3[%c0_1, %c0_2] : memref<64x32xbf16, #tpu.memory_space<vmem>>, vector<64x32xbf16>
    %cst = arith.constant dense<0.000000e+00> : vector<18x32xf32>
    %2 = tpu.matmul %0, %1, %cst {dimension_numbers = #tpu.dot_dimension_numbers<[1], [0], [0], [1], [0, 0, 1, 1], [], []>} : vector<18x64xbf16>, vector<64x32xbf16>, vector<18x32xf32> -> vector<18x32xf32>
    %c0_3 = arith.constant 0 : index
    %c0_4 = arith.constant 0 : index
    %3 = vector.load %arg2[%c0_3, %c0_4] : memref<18x1xf32, #tpu.memory_space<vmem>>, vector<18x1xf32>
    %c0_5 = arith.constant 0 : index
    %c0_6 = arith.constant 0 : index
    %4 = vector.load %arg4[%c0_5, %c0_6] : memref<1x32xf32, #tpu.memory_space<vmem>>, vector<1x32xf32>
    %5 = vector.broadcast %3 : vector<18x1xf32> to vector<18x32xf32>
    %6 = vector.broadcast %4 : vector<1x32xf32> to vector<18x32xf32>
    %7 = arith.mulf %5, %6 : vector<18x32xf32>
    %8 = arith.addf %2, %7 : vector<18x32xf32>
    %c0_7 = arith.constant 0 : index
    %c0_8 = arith.constant 0 : index
    %9 = vector.load %arg5[%c0_7, %c0_8] : memref<1x32xf32, #tpu.memory_space<vmem>>, vector<1x32xf32>
    %10 = vector.broadcast %9 : vector<1x32xf32> to vector<18x32xf32>
    %11 = arith.addf %8, %10 : vector<18x32xf32>
    %12 = arith.truncf %11 : vector<18x32xf32> to vector<18x32xbf16>
    %c0_9 = arith.constant 0 : index
    %c0_10 = arith.constant 0 : index
    %13 = vector.load %arg6[%c0_9, %c0_10] : memref<18x32xbf16, #tpu.memory_space<vmem>>, vector<18x32xbf16>
    tpu.vector_store %arg6[%c0_9, %c0_10], %12 {strides = array<i32>} : memref<18x32xbf16, #tpu.memory_space<vmem>>, vector<18x32xbf16>,
    return
  }
  func.func @transform_0(%arg0: i32) -> (i32, i32) {
    %c0_i32 = arith.constant 0 : i32
    %c0_i32_0 = arith.constant 0 : i32
    return %arg0, %c0_i32 : i32, i32
  }
  func.func @transform_1(%arg0: i32) -> (i32, i32) {
    %c0_i32 = arith.constant 0 : i32
    %c0_i32_0 = arith.constant 0 : i32
    return %arg0, %c0_i32 : i32, i32
  }
  func.func @transform_2(%arg0: i32) -> (i32, i32) {
    %c0_i32 = arith.constant 0 : i32
    %c0_i32_0 = arith.constant 0 : i32
    %c0_i32_1 = arith.constant 0 : i32
    return %c0_i32, %c0_i32_0 : i32, i32
  }
  func.func @transform_3(%arg0: i32) -> (i32, i32) {
    %c0_i32 = arith.constant 0 : i32
    %c0_i32_0 = arith.constant 0 : i32
    %c0_i32_1 = arith.constant 0 : i32
    return %c0_i32, %c0_i32_0 : i32, i32
  }
  func.func @transform_4(%arg0: i32) -> (i32, i32) {
    %c0_i32 = arith.constant 0 : i32
    %c0_i32_0 = arith.constant 0 : i32
    %c0_i32_1 = arith.constant 0 : i32
    return %c0_i32, %c0_i32_0 : i32, i32
  }
  func.func @transform_5(%arg0: i32) -> (i32, i32) {
    %c0_i32 = arith.constant 0 : i32
    %c0_i32_0 = arith.constant 0 : i32
    return %arg0, %c0_i32 : i32, i32
  }
}

</mosaic_0001>

<bundles_post_ra>
// kernel: tpu_custom_call.1
= control target key start
LH: loop header
LB: loop body
LE: loop exit
PB: predicated region body
PF: predicated region fallthrough
CT: control target
= control target key end

     0   :  { %v260_v2 = vmov 0   ;;  %vm93_vm0 = vcmask 523264   ;;  %s332_s0 = inlined_call_operand.vmem [shape: bf16[18,64], index: 0, kind: input, shape index: {}]   ;;  %s333_s1 = inlined_call_operand.vmem [shape: f32[18,1], index: 1, kind: input, shape index: {}]   ;;  %s334_s2 = inlined_call_operand.vmem [shape: bf16[64,32], index: 2, kind: input, shape index: {}]   ;;  %s335_s3 = inlined_call_operand.vmem [shape: f32[1,32], index: 3, kind: input, shape index: {}]   ;;  %s336_s4 = inlined_call_operand.vmem [shape: f32[1,32], index: 4, kind: input, shape index: {}]   ;;  %s337_s5 = inlined_call_operand.hbm [shape: bf16[18,32], index: 5, kind: output, shape index: {}]  }
   0x1   :  { %v232_v0 = vld [vmem:[%s334_s2 + $0x18] sm:$0xff]   ;;  %v233_v1 = vld [vmem:[%s334_s2 + $0x10] sm:$0xff]   ;;  %230 = vset.pattern.permute.xlu0 %v260_v2  ;;  %v234_v3 = vld [vmem:[%s334_s2 + $0x8] sm:$0xff]   ;;  %231 = vset.pattern.permute.xlu1 %v260_v2 }
   0x2   :  { %214 = vmatprep.subr.bf16.mxu0 %v232_v0  ;;  %v236_v4 = vld [vmem:[%s332_s0] sm:$0xff]   ;;  %v35_v6 = vld [vmem:[%s333_s1 + $0x10] sm:$0x3]  ;;  %v34_v7 = vld [vmem:[%s333_s1 + $0x8] sm:$0xff] }
   0x3   :  { %215 = vmatpush3.bf16.msra.mxu0 %v232_v0  ;;  %v33_v5 = vld [vmem:[%s333_s1] sm:$0xff]  ;;  %222 = vmatprep.mubr.msk.bf16.mxu0 %vm93_vm0, %v236_v4 }
   0x4   :  { %216 = vmatprep.subr.bf16.mxu0 %v233_v1  ;;  %39 = vperm.xlu0 %230, %v33_v5  }
   0x5   :  { %49 = vperm.xlu1 %231, %v35_v6  }
   0x7   :  { %217 = vmatpush3.bf16.msra.mxu0 %v233_v1 }
   0x8   :  { %10 = vsyncpa [#allocation3], 0  ;;  %218 = vmatprep.subr.bf16.mxu0 %v234_v3  ;;  %v235_v8 = vld [vmem:[%s334_s2] sm:$0xff]   ;;  %44 = vperm.xlu0 %230, %v34_v7   ;;  %v237_v9 = vld [vmem:[%s332_s0 + $0x8] ss:$0 sps:$4 sm:$0x11]  }
   0x9   :  { %v192_v10 = vld [vmem:[%s335_s3] ss:$0 sm:$0xff]  ;;  %vm174_vm1 = vcmask 253952   ;;  %vm171_vm2 = vcmask 257024   ;;  %s261_s0 = smov [#allocation2]  }
   0xa   :  { %v201_v16 = vld [vmem:[%s336_s4] ss:$0 sm:$0xff]  ;;  %s181_s3 = sshll.u32 %s261_s0, 4  ;;  %s182_s3 = int_to_ptr.vmem [resolvable:$true] %s181_s3 }
   0xb   :  { %219 = vmatpush3.bf16.msra.mxu0 %v234_v3  ;;  %s238_s4 = scalar_lea.vmem %s182_s3, 192  ;;  %p243_p1 = scmp.lt.s32.totalorder %s182_s3, %s182_s3 }
   0xc   :  { %220 = vmatprep.subr.bf16.mxu0 %v235_v8  ;;  %p239_p0 = scmp.ne.s32.totalorder %s182_s3, %s238_s4  ;;  %p244_p2 = scmp.lt.s32.totalorder %s238_s4, %s238_s4 }
   0xe   :  { %p245_p3 = por %p244_p2, %p243_p1 }
   0xf   :  { %221 = vmatpush3.bf16.msra.mxu0 %v235_v8 }
  0x10   :  { %p246_p4 = pnand %p245_p3, %p239_p0 }
  0x12   :  { %223 = vmatmul.mubr.msk.bf16.vlgmr.msra.gmra.mxu0 %vm93_vm0, %v237_v9 }
  0x7f   :  { %v40_v12 = vpop.permute.xlu0 %39 }
  0x80   :  { %v50_v11 = vpop.permute.xlu1 %49  ;;  %v58_v14 = vmul.f32 %v192_v10, %v40_v12 }
  0x81   :  { %v60_v13 = vmul.f32 %v192_v10, %v50_v11 }
  0x83   :  { %v45_v18 = vpop.permute.xlu0 %44 }
  0x84   :  { %v59_v23 = vmul.f32 %v192_v10, %v45_v18 }
  0xd2   :  { %v224_v15 = vpop.f32.mrf.mxu0 }
  0xd3   :  { %v143_v17 = vadd.f32 %v224_v15, %v60_v13 }
  0xd4   :  { %v134_v19 = vpop.f32.mrf.mxu0 }
  0xd5   :  { %v157_v20 = vadd.f32 %v201_v16, %v143_v17  ;;  %v135_v21 = vadd.f32 %v134_v19, %v58_v14 }
  0xd6   :  { %v225_v22 = vpop.f32.mrf.mxu0 }
  0xd7   :  { %v207_v24 = vpack.c.bf16 %v157_v20, %v157_v20  ;;  %v155_v25 = vadd.f32 %v201_v16, %v135_v21 }
  0xd8   :  { %v137_v26 = vpop.f32.mrf.mxu0 }
  0xd9   :  { %175 = vst.msk [vmem:[#allocation2 + $0x8] sm:$0x1] %vm174_vm1, %v207_v24  ;;  %v205_v27 = vpack.c.bf16 %v155_v25, %v155_v25  ;;  %v138_v28 = vadd.f32 %v137_v26, %v59_v23 }
  0xdb   :  { %172 = vst.msk [vmem:[#allocation2] sm:$0xf] %vm171_vm2, %v205_v27  ;;  %v156_v29 = vadd.f32 %v201_v16, %v138_v28 }
  0xdd   :  { %v206_v30 = vpack.c.bf16 %v156_v29, %v156_v29 }
  0xdf   :  { %173 = vst.msk [vmem:[#allocation2 + $0x4] sm:$0xf] %vm171_vm2, %v206_v30 }
  0xe0   :  { %249 = shalt.err (!%p246_p4)
}
  0xe1   :  { %s262_s13 = smov 64   ;;  %s263_s14 = smov 4  }
  0xe2   :  { %187 = dma.vmem_to_hbm [thread:$0]  %s182_s3, 192, %s337_s5, [#allocation3], %s262_s13, %s262_s13, %s263_s14  }
  0xe3   :  { %258 = dma.done.wait [#allocation3], 192  }
  0xe4   :  { %259 = vsyncadd [#allocation3], 4294967104 }
  0xe5   :  { %191 = vsyncpa [#allocation3], 1 }

</bundles_post_ra>
